<compile_context>
chip_gen: v5e
topology: v5e:2x2
jax: 0.10.0
libtpu: 0.0.40
codegen_flags: <defaults>
</compile_context>

<pallas_src>
import jax
import jax.numpy as jnp
from jax import lax
from jax.experimental import pallas as pl
from jax.experimental.pallas import tpu as pltpu


def _downsample_gemm_kernel(taps_ref, w_ref, b_ref, o_ref):
    # taps_ref: (9*C_in, TILE_M)  fused-tap input slab for this (batch, m-tile)
    # w_ref:    (C_out, 9*C_in)   fused conv weight (block index constant -> resident)
    # b_ref:    (C_out, 1)        bias (f32)
    # o_ref:    (C_out, TILE_M)   output tile (channel-major, lane-dense), f32
    acc = jnp.dot(w_ref[...], taps_ref[...], preferred_element_type=jnp.float32)
    o_ref[...] = (acc + b_ref[...]).astype(o_ref.dtype)


def downsample_forward(x_nchw, weight_oihw, bias, *,
                       tile_m=1024,
                       input_dtype=jnp.float32,
                       vmem_limit_bytes=48 * 1024 * 1024):
    """Forward pass of Downsample.

    x_nchw:      (N, C, H, W)  float32
    weight_oihw: (C, C, 3, 3)  float32   (PyTorch Conv2d layout)
    bias:        (C,)          float32
    input_dtype: dtype for the GEMM operands (jnp.float32 for exact semantics,
                 jnp.bfloat16 to halve HBM read traffic; accumulation is f32 either way)
    returns:     (N, C, Ho, Wo) float32 with Ho = Wo = (H - 1) // 2 + 1
    """
    N, C, H, W = x_nchw.shape
    KH = KW = 3
    stride = 2
    LANE = 128

    # ReflectionPad2d(1) directly in NCHW — no layout transpose needed.
    x_pad = jnp.pad(x_nchw, ((0, 0), (0, 0), (1, 1), (1, 1)), mode="reflect")
    Hp, Wp = H + 2, W + 2
    Ho = (Hp - KH) // stride + 1
    Wo = (Wp - KW) // stride + 1
    M_sp = Ho * Wo
    K = KH * KW * C  # fused contraction size

    # Gather the 9 strided taps and fold them into the contraction axis:
    #   (N, 9, C, Ho, Wo) -> (N, 9*C, M_sp), row index = tap*C + c_in.
    taps = jnp.stack(
        [x_pad[:, :,
               kh:kh + stride * (Ho - 1) + 1:stride,
               kw:kw + stride * (Wo - 1) + 1:stride]
         for kh in range(KH) for kw in range(KW)],
        axis=1,
    ).reshape(N, K, M_sp).astype(input_dtype)

    # Weights (C_out, C_in, KH, KW) -> (C_out, KH, KW, C_in) -> (C_out, 9*C_in),
    # column index = tap*C_in + c_in (matches the taps row ordering).  Bias as f32 column.
    w_fused = jnp.transpose(weight_oihw, (0, 2, 3, 1)).reshape(C, K).astype(input_dtype)
    b_col = bias.reshape(C, 1).astype(jnp.float32)

    in_itemsize = jnp.dtype(input_dtype).itemsize

    # ---- Lane-dense tile_m selection, bounded by the VMEM budget. ----
    m_needed = pl.cdiv(M_sp, LANE) * LANE          # minimal lane-dense cover of M_sp
    tile_m = max(LANE, (int(tile_m) // LANE) * LANE)
    tile_m = min(tile_m, m_needed)

    def _residency(tm):
        # taps (double-buffered) + f32 output (double-buffered)
        # + resident fused weight (count 2x for safety) + bias.
        return (2 * K * tm * in_itemsize
                + 2 * C * tm * 4
                + 2 * C * K * in_itemsize
                + 2 * C * 4)

    budget = int(vmem_limit_bytes * 0.85)
    while tile_m > LANE and _residency(tile_m) > budget:
        tile_m -= LANE

    num_m = pl.cdiv(M_sp, tile_m)
    # v7x has 2 TensorCores: make sure the two "parallel" axes expose >= 2 grid points.
    if N * num_m < 2 and M_sp > LANE:
        tile_m = max(LANE, pl.cdiv(M_sp, 2 * LANE) * LANE)
        num_m = pl.cdiv(M_sp, tile_m)

    M_pad = num_m * tile_m
    if M_pad != M_sp:
        taps = jnp.pad(taps, ((0, 0), (0, 0), (0, M_pad - M_sp)))

    cost = pl.CostEstimate(
        flops=int(2 * N * M_sp * K * C),
        transcendentals=0,
        bytes_accessed=int(N * K * M_pad * in_itemsize     # taps read
                           + C * K * in_itemsize           # weight read (resident)
                           + C * 4                         # bias read
                           + N * C * M_pad * 4),           # output write (f32)
    )

    out = pl.pallas_call(
        _downsample_gemm_kernel,
        out_shape=jax.ShapeDtypeStruct((N, C, M_pad), jnp.float32),
        grid_spec=pltpu.PrefetchScalarGridSpec(
            num_scalar_prefetch=0,
            grid=(N, num_m),
            in_specs=[
                # taps: (N, 9C, M_pad) -> block (9C, tile_m), batch dim squeezed
                pl.BlockSpec((None, K, tile_m), lambda n, m: (n, 0, m)),
                # fused weight: constant block index -> DMA'd once, stays resident
                pl.BlockSpec((C, K), lambda n, m: (0, 0)),
                # bias: (C, 1), constant
                pl.BlockSpec((C, 1), lambda n, m: (0, 0)),
            ],
            out_specs=pl.BlockSpec((None, C, tile_m), lambda n, m: (n, 0, m)),
        ),
        compiler_params=pltpu.CompilerParams(
            dimension_semantics=("parallel", "parallel"),
            vmem_limit_bytes=int(vmem_limit_bytes),
        ),
        cost_estimate=cost,
    )(taps, w_fused, b_col)

    # Drop lane padding; columns are already (Ho, Wo) row-major, channels already major.
    # (Padded columns hold bias values, not zeros — this slice must stay.)
    return out[:, :, :M_sp].reshape(N, C, Ho, Wo)


def _reference(x_nchw, weight_oihw, bias):
    x_pad = jnp.pad(x_nchw, ((0, 0), (0, 0), (1, 1), (1, 1)), mode="reflect")
    y = lax.conv_general_dilated(
        x_pad, weight_oihw, window_strides=(2, 2), padding="VALID",
        dimension_numbers=("NCHW", "OIHW", "NCHW"))
    return y + bias.reshape(1, -1, 1, 1)


if __name__ == "__main__":
    key = jax.random.PRNGKey(0)
    kx, kw, kb = jax.random.split(key, 3)

    N, C, H, W = 2, 4, 16, 16
    x = jax.random.normal(kx, (N, C, H, W), dtype=jnp.float32)

    # Deterministic synthetic params (Conv2d(C, C, 3) shapes), uniform like PyTorch default.
    fan_in = C * 3 * 3
    bound = 1.0 / (fan_in ** 0.5)
    weight = jax.random.uniform(kw, (C, C, 3, 3), jnp.float32, -bound, bound)
    bias = jax.random.uniform(kb, (C,), jnp.float32, -bound, bound)

    ref = _reference(x, weight, bias)

    # Exact-semantics path (f32 operands, f32 MXU accumulation).
    fwd_f32 = jax.jit(lambda a, b, c: downsample_forward(a, b, c, input_dtype=jnp.float32))
    out_f32 = jax.block_until_ready(fwd_f32(x, weight, bias))
    assert out_f32.shape == ref.shape == (N, C, 8, 8), (out_f32.shape, ref.shape)
    assert jnp.allclose(out_f32, ref, atol=2e-5, rtol=2e-5)

    # HBM-optimized path (bf16 operands, f32 accumulation) — looser tolerance.
    fwd_bf16 = jax.jit(lambda a, b, c: downsample_forward(a, b, c, input_dtype=jnp.bfloat16))
    out_bf16 = jax.block_until_ready(fwd_bf16(x, weight, bias))
    assert out_bf16.shape == ref.shape
    assert jnp.allclose(out_bf16, ref, atol=2e-2, rtol=2e-2)

    print("KERNEL_OK")
</pallas_src>

<mosaic_0001>
module attributes {stable_mosaic.version = 11 : i64} {
  func.func @_downsample_gemm_kernel(%arg0: i32, %arg1: i32, %arg2: memref<1x36x128xf32, #tpu.memory_space<vmem>>, %arg3: memref<4x36xf32, #tpu.memory_space<vmem>>, %arg4: memref<4x1xf32, #tpu.memory_space<vmem>>, %arg5: memref<1x4x128xf32, #tpu.memory_space<vmem>>) attributes {dimension_semantics = [#tpu.dimension_semantics<parallel>, #tpu.dimension_semantics<parallel>], iteration_bounds = array<i64: 2, 1>, scalar_prefetch = 0 : i64, scratch_operands = 0 : i64, tpu.core_type = #tpu.core_type<tc>, window_params = [{transform_indices = @transform_0, window_bounds = array<i64: 1, 36, 128>}, {pipeline_mode = #tpu.pipeline_mode<synchronous>, transform_indices = @transform_1, window_bounds = array<i64: 4, 36>}, {pipeline_mode = #tpu.pipeline_mode<synchronous>, transform_indices = @transform_2, window_bounds = array<i64: 4, 1>}, {transform_indices = @transform_3, window_bounds = array<i64: 1, 4, 128>}]} {
    %c0 = arith.constant 0 : index
    %c0_0 = arith.constant 0 : index
    %0 = vector.load %arg3[%c0, %c0_0] : memref<4x36xf32, #tpu.memory_space<vmem>>, vector<4x36xf32>
    %c0_1 = arith.constant 0 : index
    %c0_2 = arith.constant 0 : index
    %c0_3 = arith.constant 0 : index
    %1 = vector.load %arg2[%c0_1, %c0_2, %c0_3] : memref<1x36x128xf32, #tpu.memory_space<vmem>>, vector<1x36x128xf32>
    %2 = vector.shape_cast %1 : vector<1x36x128xf32> to vector<36x128xf32>
    %cst = arith.constant dense<0.000000e+00> : vector<4x128xf32>
    %3 = tpu.matmul %0, %2, %cst {dimension_numbers = #tpu.dot_dimension_numbers<[1], [0], [0], [1], [0, 0, 1, 1], [], []>} : vector<4x36xf32>, vector<36x128xf32>, vector<4x128xf32> -> vector<4x128xf32>
    %c0_4 = arith.constant 0 : index
    %c0_5 = arith.constant 0 : index
    %4 = vector.load %arg4[%c0_4, %c0_5] : memref<4x1xf32, #tpu.memory_space<vmem>>, vector<4x1xf32>
    %5 = vector.broadcast %4 : vector<4x1xf32> to vector<4x128xf32>
    %6 = arith.addf %3, %5 : vector<4x128xf32>
    %c0_6 = arith.constant 0 : index
    %c0_7 = arith.constant 0 : index
    %c0_8 = arith.constant 0 : index
    %7 = vector.load %arg5[%c0_6, %c0_7, %c0_8] : memref<1x4x128xf32, #tpu.memory_space<vmem>>, vector<1x4x128xf32>
    %8 = vector.shape_cast %7 : vector<1x4x128xf32> to vector<4x128xf32>
    %9 = vector.shape_cast %6 : vector<4x128xf32> to vector<1x4x128xf32>
    tpu.vector_store %arg5[%c0_6, %c0_7, %c0_8], %9 {strides = array<i32>} : memref<1x4x128xf32, #tpu.memory_space<vmem>>, vector<1x4x128xf32>,
    return
  }
  func.func @transform_0(%arg0: i32, %arg1: i32) -> (i32, i32, i32) {
    %c0_i32 = arith.constant 0 : i32
    %c0_i32_0 = arith.constant 0 : i32
    return %arg0, %c0_i32, %arg1 : i32, i32, i32
  }
  func.func @transform_1(%arg0: i32, %arg1: i32) -> (i32, i32) {
    %c0_i32 = arith.constant 0 : i32
    %c0_i32_0 = arith.constant 0 : i32
    %c0_i32_1 = arith.constant 0 : i32
    return %c0_i32, %c0_i32_0 : i32, i32
  }
  func.func @transform_2(%arg0: i32, %arg1: i32) -> (i32, i32) {
    %c0_i32 = arith.constant 0 : i32
    %c0_i32_0 = arith.constant 0 : i32
    %c0_i32_1 = arith.constant 0 : i32
    return %c0_i32, %c0_i32_0 : i32, i32
  }
  func.func @transform_3(%arg0: i32, %arg1: i32) -> (i32, i32, i32) {
    %c0_i32 = arith.constant 0 : i32
    %c0_i32_0 = arith.constant 0 : i32
    return %arg0, %c0_i32, %arg1 : i32, i32, i32
  }
}

</mosaic_0001>

<bundles_post_ra>
// kernel: _lambda_.1
= control target key start
LH: loop header
LB: loop body
LE: loop exit
PB: predicated region body
PF: predicated region fallthrough
CT: control target
= control target key end

     0   :  { %s401_s12 = smov 0   ;;  %s403_s13 = smov 0   ;;  %s440_s0 = inlined_call_operand.vmem [shape: f32[2,36,128], index: 0, kind: input, shape index: {}]   ;;  %s441_s1 = inlined_call_operand.vmem [shape: f32[4,36], index: 1, kind: input, shape index: {}]   ;;  %s442_s2 = inlined_call_operand.vmem [shape: f32[4,1], index: 2, kind: input, shape index: {}]   ;;  %s443_s3 = inlined_call_operand.vmem [shape: f32[2,4,128], index: 3, kind: output, shape index: {}]  }
   0x1   :  { %s405_s14 = smov 0  }
   0x2 LB: > { %s25_s15 = sadd.s32 1, %s374_s13  ;;  %p322_p0 = scmp.ge.s32.totalorder %s378_s14, 1  ;;  %s378_s14 = sphi %s405_s14, %s13_s14   ;;  %s374_s13 = sphi %s403_s13, %s445_s13   ;;  %s370_s12 = sphi %s401_s12, %s444_s12  }
   0x3   : > { %p27_p1 = scmp.ge.s32.totalorder %s25_s15, 2  ;;  %p156_p2 = scmp.lt.s32.totalorder %s378_s14, 3 }
   0x5   : > { %s447_s15 = smov (%p27_p1, %s25_s15), 0  ;;  %p157_p3 = pnand %p322_p0, %p156_p2 }
   0x6   : > { %p185_p4 = scmp.lt.s32.totalorder (!%p157_p3), %s370_s12, 1 }
   0x7   : > { %160 = sbr.rel (%p157_p3) target bundleno = 155 (0x9b), region = 32 }
   0xc   : > { %v380_v0 = vmov 0   ;;  %v206_v1 = vld [vmem:[%s442_s2] sm:$0xf]  ;;  %s449_s12 = smov (!%p185_p4, %s370_s12), 1  ;;  %vm216_vm0 = vcmask 1043456   ;;  %vm212_vm1 = vcmask 293888  }
   0xd   : > { %355 = vset.pattern.permute.xlu0 %v380_v0  ;;  %s329_s18 = smul.u32 40, %s449_s12  ;;  %v200_v7 = vld [vmem:[%s441_s1] sm:$0xf]  ;;  %s324_s24 = sshll.u32 %s449_s12, 2 }
   0xe   : > { %209 = vperm.xlu0 %355, %v206_v1   ;;  %s199_s27 = scalar_lea.vmem %s443_s3, %s324_s24 }
   0xf   : > { %s192_s21 = scalar_lea.vmem %s440_s0, %s329_s18 }
  0x10   : > { %v205_v2 = vld [vmem:[%s192_s21 + $0x20] sm:$0xf]  ;;  %v204_v3 = vld [vmem:[%s192_s21 + $0x18] sm:$0xff]  ;;  %v203_v4 = vld [vmem:[%s192_s21 + $0x10] sm:$0xff] }
  0x11   : > { %325 = vmatpush.msk.msra.mxu0 %vm216_vm0, %v205_v2  ;;  %v202_v5 = vld [vmem:[%s192_s21 + $0x8] sm:$0xff]  ;;  %v201_v6 = vld [vmem:[%s192_s21] sm:$0xff] }
  0x13   : > { %232 = vmatpush.msra.mxu0 %v204_v3 }
  0x15   : > { %233 = vmatpush.msra.mxu0 %v203_v4 }
  0x17   : > { %234 = vmatpush.msra.mxu0 %v202_v5 }
  0x19   : > { %235 = vmatpush.msra.mxu0 %v201_v6 }
  0x1a   : > { %326 = vmatmul.msk.f32.vlgmr.msra.gmra.mxu0 %vm212_vm1, %v200_v7 }
  0x80   : > { %v210_v8 = vpop.permute.xlu0 %209 }
  0x97   : > { %v237_v9 = vpop.f32.mrf.mxu0 }
  0x98   : > { %v238_v10 = vadd.f32 %v237_v9, %v210_v8 }
  0x9a   : > { %240 = vst [vmem:[%s199_s27] sm:$0xf] %v238_v10 }
  0x9b PF: > { %s13_s14 = sadd.s32 1, %s378_s14   ;;  %s444_s12 = smov %s374_s13 }
  0x9c   : > { %p10_p5 = scmp.ge.s32.totalorder %s13_s14, 4   ;;  %s445_s13 = smov %s447_s15 }
  0x9e   :  { %12 = sbr.rel (!%p10_p5) target bundleno = 2 (0x2), region = 62 }

</bundles_post_ra>
